<compile_context>
chip_gen: v6e
topology: v6e:2x2x1
jax: 0.10.0
libtpu: 0.0.40
codegen_flags: <defaults>
</compile_context>

<pallas_src>
import functools

import jax
import jax.numpy as jnp
from jax.experimental import pallas as pl
from jax.experimental.pallas import tpu as pltpu


def _layernorm_kernel(x_ref, gamma_ref, beta_ref, o_ref, *, eps, inv_d):
    # x_ref:     (tm, d) row tile.  The last grid step may be a partial block;
    #            its out-of-range rows hold junk but are never stored (Pallas
    #            masks the partial writeback) and LayerNorm is strictly per-row,
    #            so they cannot contaminate valid rows.
    # gamma_ref: (1, d)   broadcast over rows
    # beta_ref:  (1, d)
    x = x_ref[...].astype(jnp.float32)

    mean = jnp.sum(x, axis=-1, keepdims=True) * inv_d
    xc = x - mean
    var = jnp.sum(xc * xc, axis=-1, keepdims=True) * inv_d  # correction=0 (biased)
    inv = jax.lax.rsqrt(var + eps)                           # EUP

    out = (gamma_ref[...].astype(jnp.float32) * (xc * inv)
           + beta_ref[...].astype(jnp.float32))
    o_ref[...] = out.astype(o_ref.dtype)


def _round_up(v, m):
    return ((v + m - 1) // m) * m


def layer_norm(x, gamma, beta, eps=1e-5):
    """x: (..., d_model). Returns same shape/dtype as x."""
    orig_shape = x.shape
    d = int(orig_shape[-1])
    rows = 1
    for s in orig_shape[:-1]:
        rows *= int(s)

    x2 = x.reshape(rows, d)
    gamma2 = gamma.reshape(1, d)
    beta2 = beta.reshape(1, d)

    itemsize = jnp.dtype(x.dtype).itemsize
    # sublane packing: f32 tiles are [8,128], bf16 [16,128], int8/fp8 [32,128]
    sublane = 8 * max(1, 4 // itemsize)

    # ---- VMEM budget (generation-aware) -------------------------------------
    try:
        vmem_cap = int(pltpu.get_tpu_info().vmem_capacity_bytes)
    except Exception:
        vmem_cap = 64 * 1024 * 1024  # conservative (v7x per-TC size)
    budget = min(vmem_cap // 2, 48 * 1024 * 1024)

    # per-row working set:
    #   2x double-buffered input tile + 2x double-buffered output tile (itemsize)
    #   + ~3 f32 temporaries (x in f32, centered x, f32 output) inside the body
    bytes_per_row = d * (4 * itemsize + 3 * 4)

    # ---- row-tile selection --------------------------------------------------
    tm_cap = max(sublane, budget // max(1, bytes_per_row))
    tm_cap = max(sublane, (tm_cap // sublane) * sublane)

    if rows <= sublane:
        # single full-extent block (block shape == array shape is always legal)
        tm = rows
    else:
        tm = min(512, tm_cap)                       # 512 rows is past the roofline knee
        tm = min(tm, _round_up(rows, sublane))
        tm = max(sublane, (tm // sublane) * sublane)
        # target enough grid steps to hide prologue/epilogue DMA and keep both
        # v7x TensorCores pipelining several tiles each
        target_steps = 8
        while pl.cdiv(rows, tm) < target_steps and tm > sublane:
            tm = max(sublane, ((tm // 2) // sublane) * sublane)

    grid = (pl.cdiv(rows, tm),)   # last block may be partial: Pallas masks the store

    # scoped VMEM limit sized to the chosen tile, with headroom for Mosaic
    # internal scratch / semaphores (never pinned to physical capacity)
    vmem_limit = int(tm * bytes_per_row + 6 * d * 4 + (2 << 20))
    vmem_limit = max(vmem_limit, 16 * 1024 * 1024)
    vmem_limit = min(vmem_limit, vmem_cap - 8 * 1024 * 1024)

    kernel = functools.partial(
        _layernorm_kernel, eps=float(eps), inv_d=1.0 / float(d)
    )

    out = pl.pallas_call(
        kernel,
        out_shape=jax.ShapeDtypeStruct((rows, d), x.dtype),
        grid_spec=pltpu.PrefetchScalarGridSpec(
            num_scalar_prefetch=0,
            grid=grid,
            in_specs=[
                pl.BlockSpec((tm, d), lambda i: (i, 0)),
                pl.BlockSpec((1, d), lambda i: (0, 0)),   # gamma: DMA'd once
                pl.BlockSpec((1, d), lambda i: (0, 0)),   # beta:  DMA'd once
            ],
            out_specs=pl.BlockSpec((tm, d), lambda i: (i, 0)),
        ),
        compiler_params=pltpu.CompilerParams(
            dimension_semantics=("parallel",),
            vmem_limit_bytes=vmem_limit,
        ),
    )(x2, gamma2, beta2)

    return out.reshape(orig_shape)


def layer_norm_ref(x, gamma, beta, eps=1e-5):
    xf = x.astype(jnp.float32)
    mean = jnp.mean(xf, axis=-1, keepdims=True)
    var = jnp.mean((xf - mean) ** 2, axis=-1, keepdims=True)
    xn = (xf - mean) * jax.lax.rsqrt(var + eps)
    return (gamma * xn + beta).astype(x.dtype)


if __name__ == "__main__":
    key = jax.random.PRNGKey(0)
    batch, seq, d_model = 2, 8, 32

    x = jax.random.normal(key, (batch, seq, d_model), dtype=jnp.float32)

    # deterministic parameter init matching nn.Parameter(torch.ones/zeros(d_model))
    gamma = jnp.ones((d_model,), dtype=jnp.float32)
    beta = jnp.zeros((d_model,), dtype=jnp.float32)

    out = layer_norm(x, gamma, beta, eps=1e-5)
    out = jax.block_until_ready(out)

    ref = layer_norm_ref(x, gamma, beta, eps=1e-5)
    assert out.shape == x.shape and out.dtype == x.dtype
    assert jnp.allclose(out, ref, atol=1e-5, rtol=1e-5), "mismatch vs reference"

    print("KERNEL_OK")
</pallas_src>

<mosaic_0001>
module attributes {stable_mosaic.version = 11 : i64} {
  func.func @_layernorm_kernel(%arg0: i32, %arg1: memref<8x32xf32, #tpu.memory_space<vmem>>, %arg2: memref<1x32xf32, #tpu.memory_space<vmem>>, %arg3: memref<1x32xf32, #tpu.memory_space<vmem>>, %arg4: memref<8x32xf32, #tpu.memory_space<vmem>>) attributes {dimension_semantics = [#tpu.dimension_semantics<parallel>], iteration_bounds = array<i64: 2>, scalar_prefetch = 0 : i64, scratch_operands = 0 : i64, tpu.core_type = #tpu.core_type<tc>, window_params = [{transform_indices = @transform_0, window_bounds = array<i64: 8, 32>}, {pipeline_mode = #tpu.pipeline_mode<synchronous>, transform_indices = @transform_1, window_bounds = array<i64: 1, 32>}, {pipeline_mode = #tpu.pipeline_mode<synchronous>, transform_indices = @transform_2, window_bounds = array<i64: 1, 32>}, {transform_indices = @transform_3, window_bounds = array<i64: 8, 32>}]} {
    %c0 = arith.constant 0 : index
    %c0_0 = arith.constant 0 : index
    %0 = vector.load %arg1[%c0, %c0_0] : memref<8x32xf32, #tpu.memory_space<vmem>>, vector<8x32xf32>
    %cst = arith.constant dense<0.000000e+00> : vector<8xf32>
    %1 = vector.multi_reduction <add>, %0, %cst [1] : vector<8x32xf32> to vector<8xf32>
    %2 = vector.shape_cast %1 : vector<8xf32> to vector<8x1xf32>
    %cst_1 = arith.constant 3.125000e-02 : f32
    %3 = vector.broadcast %cst_1 : f32 to vector<8x1xf32>
    %4 = arith.mulf %2, %3 : vector<8x1xf32>
    %5 = vector.broadcast %4 : vector<8x1xf32> to vector<8x32xf32>
    %6 = arith.subf %0, %5 : vector<8x32xf32>
    %7 = arith.mulf %6, %6 : vector<8x32xf32>
    %cst_2 = arith.constant dense<0.000000e+00> : vector<8xf32>
    %8 = vector.multi_reduction <add>, %7, %cst_2 [1] : vector<8x32xf32> to vector<8xf32>
    %9 = vector.shape_cast %8 : vector<8xf32> to vector<8x1xf32>
    %cst_3 = arith.constant 3.125000e-02 : f32
    %10 = vector.broadcast %cst_3 : f32 to vector<8x1xf32>
    %11 = arith.mulf %9, %10 : vector<8x1xf32>
    %cst_4 = arith.constant 9.99999974E-6 : f32
    %12 = vector.broadcast %cst_4 : f32 to vector<8x1xf32>
    %13 = arith.addf %11, %12 : vector<8x1xf32>
    %14 = math.rsqrt %13 : vector<8x1xf32>
    %c0_5 = arith.constant 0 : index
    %c0_6 = arith.constant 0 : index
    %15 = vector.load %arg2[%c0_5, %c0_6] : memref<1x32xf32, #tpu.memory_space<vmem>>, vector<1x32xf32>
    %16 = vector.broadcast %14 : vector<8x1xf32> to vector<8x32xf32>
    %17 = arith.mulf %6, %16 : vector<8x32xf32>
    %18 = vector.broadcast %15 : vector<1x32xf32> to vector<8x32xf32>
    %19 = arith.mulf %18, %17 : vector<8x32xf32>
    %c0_7 = arith.constant 0 : index
    %c0_8 = arith.constant 0 : index
    %20 = vector.load %arg3[%c0_7, %c0_8] : memref<1x32xf32, #tpu.memory_space<vmem>>, vector<1x32xf32>
    %21 = vector.broadcast %20 : vector<1x32xf32> to vector<8x32xf32>
    %22 = arith.addf %19, %21 : vector<8x32xf32>
    %c0_9 = arith.constant 0 : index
    %c0_10 = arith.constant 0 : index
    %23 = vector.load %arg4[%c0_9, %c0_10] : memref<8x32xf32, #tpu.memory_space<vmem>>, vector<8x32xf32>
    tpu.vector_store %arg4[%c0_9, %c0_10], %22 {strides = array<i32>} : memref<8x32xf32, #tpu.memory_space<vmem>>, vector<8x32xf32>,
    return
  }
  func.func @transform_0(%arg0: i32) -> (i32, i32) {
    %c0_i32 = arith.constant 0 : i32
    %c0_i32_0 = arith.constant 0 : i32
    return %arg0, %c0_i32 : i32, i32
  }
  func.func @transform_1(%arg0: i32) -> (i32, i32) {
    %c0_i32 = arith.constant 0 : i32
    %c0_i32_0 = arith.constant 0 : i32
    %c0_i32_1 = arith.constant 0 : i32
    return %c0_i32, %c0_i32_0 : i32, i32
  }
  func.func @transform_2(%arg0: i32) -> (i32, i32) {
    %c0_i32 = arith.constant 0 : i32
    %c0_i32_0 = arith.constant 0 : i32
    %c0_i32_1 = arith.constant 0 : i32
    return %c0_i32, %c0_i32_0 : i32, i32
  }
  func.func @transform_3(%arg0: i32) -> (i32, i32) {
    %c0_i32 = arith.constant 0 : i32
    %c0_i32_0 = arith.constant 0 : i32
    return %arg0, %c0_i32 : i32, i32
  }
}

</mosaic_0001>

<bundles_post_ra>
// kernel: tpu_custom_call.1
= control target key start
LH: loop header
LB: loop body
LE: loop exit
PB: predicated region body
PF: predicated region fallthrough
CT: control target
= control target key end

     0   :  { %8 = vsyncpa [#allocation3], 0  ;;  %s630_s0 = inlined_call_operand.hbm [shape: f32[16,32], index: 0, kind: input, shape index: {}]   ;;  %s631_s1 = inlined_call_operand.vmem [shape: f32[1,32], index: 1, kind: input, shape index: {}]   ;;  %s632_s2 = inlined_call_operand.vmem [shape: f32[1,32], index: 2, kind: input, shape index: {}]   ;;  %s633_s3 = inlined_call_operand.hbm [shape: f32[16,32], index: 3, kind: output, shape index: {}]  }
   0x1   :  { %10 = vsyncpa [#allocation3 + $0x1], 0 }
   0x2   :  { %11 = vsyncpa [#allocation4], 0 }
   0x3   :  { %13 = vsyncpa [#allocation4 + $0x1], 0  ;;  %s480_s12 = smov 0   ;;  %s482_s13 = smov 0  }
   0x4   :  { %s484_s14 = smov 0   ;;  %s486_s15 = smov 0  }
   0x5 LB: > { %s501_s16 = sadd.s32 4294967295, %s456_s15   ;;  %s302_s17 = sadd.s32 4294967294, %s456_s15   ;;  %s456_s15 = sphi %s486_s15, %s650_s15   ;;  %s452_s14 = sphi %s484_s14, %s649_s14   ;;  %s448_s13 = sphi %s482_s13, %s648_s13   ;;  %s444_s12 = sphi %s480_s12, %s647_s12  }
   0x6   : > { %s505_s18 = sadd.s32 1, %s456_s15   ;;  %s26_s19 = sadd.s32 1, %s452_s14 }
   0x7   : > { %s23_s20 = ssub.s32 %s456_s15, %s505_s18  ;;  %p33_p0 = scmp.ne.s32.totalorder %s452_s14, %s448_s13 }
   0x8   : > { %p24_p1 = scmp.eq.s32.totalorder %s23_s20, 0  ;;  %p34_p2 = scmp.eq.s32.totalorder %s456_s15, 0 }
   0x9   : > { %p39_p3 = scmp.ne.s32.totalorder %s448_s13, %s444_s12  ;;  %p40_p4 = scmp.eq.s32.totalorder %s501_s16, 0 }
   0xa   : > { %s517_s21 = scalar_select %p24_p1, %s452_s14, %s26_s19  }
   0xb   : > { %p519_p5 = por %p34_p2, %p33_p0  ;;  %p523_p6 = por %p40_p4, %p39_p3 }
   0xc   : > { %p105_p7 = scmp.eq.s32.totalorder %s501_s16, 1  ;;  %p111_p8 = scmp.eq.s32.totalorder %s302_s17, 1 }
   0xd   : > { %s637_s23 = scalar_select %p523_p6, 1, 0 }
   0xe   : > { %p328_p10 = scmp.lt.s32.totalorder %s456_s15, 2  ;;  %p530_p11 = por %p105_p7, %p33_p0 }
   0xf   : > { %p534_p12 = por %p111_p8, %p39_p3  ;;  %s137_s26 = sand.u32 1, %s452_s14  }
  0x10   : > { %s638_s24 = scalar_select %p530_p11, 1, 0 }
  0x11   : > { %s639_s25 = scalar_select %p534_p12, 1, 0 }
  0x12   : > { %s306_s27 = sshll.u32 %s456_s15, 7  ;;  %s305_s28 = sshll.u32 %s137_s26, 3 }
  0x13   : > { %s543_s4 = scalar_lea.hbm %s630_s0, %s306_s27  ;;  %s141_s5 = scalar_lea.vmem [#allocation2], %s305_s28 }
  0x14   : > { %s148_s6 = sshll.u32 %s141_s5, 4  ;;  %p547_p13 = pnand %p328_p10, %p519_p5  ;;  %s551_s6 = int_to_ptr.vmem [resolvable:$true] %s148_s6 }
  0x15   : > { %s138_s8 = scalar_lea.sflag [#allocation3], %s137_s26  ;;  %s364_s9 = scalar_lea.hbm %s543_s4, 128 }
  0x16   : > { %p365_p2 = scmp.ne.s32.totalorder %s543_s4, %s364_s9  ;;  %p366_p3 = pneg %p547_p13 }
  0x17   : > { %s369_s17 = scalar_lea.hbm %s630_s0, 256  ;;  %p370_p5 = scmp.lt.s32.totalorder %s543_s4, %s630_s0 }
  0x18   : > { %p367_p4 = pnand %p366_p3, %p365_p2  ;;  %p371_p8 = scmp.lt.s32.totalorder %s369_s17, %s364_s9 }
  0x1a   : > { %p368_p7 = pneg %p367_p4  ;;  %p372_p10 = por %p371_p8, %p370_p5 }
  0x1c   : > { %p373_p9 = pnand %p372_p10, %p368_p7 }
  0x1e   : > { %376 = shalt.err (!%p373_p9)
}
  0x1f   : > { %s377_s22 = scalar_lea.vmem %s551_s6, 128  ;;  %s458_s26 = smov [#allocation2]  }
  0x20   : > { %p378_p0 = scmp.ne.s32.totalorder %s551_s6, %s377_s22  ;;  %s382_s27 = sshll.u32 %s458_s26, 4  ;;  %s383_s27 = int_to_ptr.vmem [resolvable:$false] %s382_s27 }
  0x21   : > { %s384_s28 = scalar_lea.vmem %s383_s27, 256  ;;  %p385_p4 = scmp.lt.s32.totalorder %s551_s6, %s383_s27 }
  0x22   : > { %p380_p1 = pnand %p378_p0, %p366_p3  ;;  %p386_p12 = scmp.lt.s32.totalorder %s384_s28, %s377_s22 }
  0x24   : > { %p381_p2 = pneg %p380_p1  ;;  %p387_p11 = por %p386_p12, %p385_p4 }
  0x26   : > { %p388_p6 = pnand %p387_p11, %p381_p2 }
  0x28   : > { %391 = shalt.err (!%p388_p6)
}
  0x29   : > { %323 = dma.hbm_to_vmem [thread:$0]  (!%p547_p13), %s543_s4, 128, %s551_s6, %s138_s8  }
  0x2a   : > { %p641_p9 = scmp.lt.s32.totalorder %s456_s15, 3  ;;  %p642_p7 = scmp.ge.s32.totalorder %s456_s15, 1 }
  0x2c   : > { %p154_p0 = pnand %p642_p7, %p641_p9 }
  0x2d   : > { %s578_s29 = sand.u32 (!%p154_p0), 1, %s448_s13   ;;  %p643_p6 = scmp.ne.s32.totalorder (!%p154_p0), %s637_s23, 0 }
  0x2e   : > { %157 = sbr.rel (%p154_p0) target bundleno = 374 (0x176), region = 32  ;;  %s308_s30 = sshll.u32 (!%p154_p0), %s578_s29, 3 }
  0x2f   : > { %s160_s5 = scalar_lea.sflag (!%p154_p0), [#allocation3], %s578_s29  ;;  %s163_s9 = scalar_lea.vmem (!%p154_p0), [#allocation2], %s308_s30 }
  0x33   : > { %435 = dma.done.wait (%p643_p6), %s160_s5, 128  }
  0x34   : > { %437 = vsyncadd (%p643_p6), %s160_s5, 4294967168  ;;  %vm187_vm0 = vcmask 261120   ;;  %v186_v0 = vld [vmem:[%s163_s9] sm:$0xff]  ;;  %s313_s8 = sshll.u32 %s501_s16, 7  ;;  %s185_s10 = scalar_lea.vmem [#allocation5], %s308_s30 }
  0x35   : > { %v188_v1 = vsel %vm187_vm0, %v186_v0, 0.0  ;;  %v310_v11 = vld [vmem:[%s631_s1] ss:$0 sm:$0xff]  ;;  %s232_s11 = sshll.u32 %s185_s10, 4  ;;  %s230_s20 = scalar_lea.hbm %s633_s3, %s313_s8  ;;  %s233_s11 = int_to_ptr.vmem [resolvable:$true] %s232_s11 }
  0x36   : > { %189 = vadd.xlane.f32.xlu0 %v188_v1  ;;  %v311_v13 = vld [vmem:[%s632_s2] ss:$0 sm:$0xff]  ;;  %s219_s22 = scalar_lea.sflag [#allocation4], %s578_s29  ;;  %s392_s26 = scalar_lea.vmem %s233_s11, 128 }
  0x37   : > { %p393_p11 = scmp.ne.s32.totalorder %s233_s11, %s392_s26  ;;  %p644_p12 = scmp.ne.s32.totalorder %s638_s24, 0 }
  0x38   : > { %s459_s27 = smov [#allocation5]  }
  0x39   : > { %p394_p13 = pnand %p393_p11, %p644_p12  ;;  %s396_s28 = sshll.u32 %s459_s27, 4  ;;  %s397_s28 = int_to_ptr.vmem [resolvable:$false] %s396_s28 }
  0x3a   : > { %s398_s16 = scalar_lea.vmem %s397_s28, 256  ;;  %p399_p3 = scmp.lt.s32.totalorder %s233_s11, %s397_s28 }
  0x3b   : > { %p395_p1 = pneg %p394_p13  ;;  %p400_p5 = scmp.lt.s32.totalorder %s398_s16, %s392_s26 }
  0x3d   : > { %p401_p8 = por %p400_p5, %p399_p3 }
  0x3f   : > { %p402_p10 = pnand %p401_p8, %p395_p1 }
  0xbf   : > { %v190_v2 = vpop.xlane.xlu0 %189 }
  0xc0   : > { %v191_v3 = vmul.f32 0.03125, %v190_v2 }
  0xc2   : > { %v192_v4 = vsub.f32 %v186_v0, %v191_v3 }
  0xc4   : > { %v193_v5 = vmul.f32 %v192_v4, %v192_v4 }
  0xc6   : > { %v194_v6 = vsel %vm187_vm0, %v193_v5, 0.0 }
  0xc7   : > { %195 = vadd.xlane.f32.xlu0 %v194_v6 }
 0x150   : > { %v196_v7 = vpop.xlane.xlu0 %195 }
 0x151   : > { %v197_v8 = vmul.f32 0.03125, %v196_v7 }
 0x153   : > { %v198_v9 = vadd.f32 1e-05, %v197_v8 }
 0x155   : > { %362 = vrsqrt.f32 %v198_v9 }
 0x162   : > { %v363_v10 = vpop.eup %362 }
 0x163   : > { %v201_v12 = vmul.f32 %v363_v10, %v192_v4 }
 0x165   : > { %v208_v14 = vmul.f32 %v310_v11, %v201_v12 }
 0x167   : > { %v216_v15 = vadd.f32 %v311_v13, %v208_v14 }
 0x169   : > { %217 = vst.msk [vmem:[%s185_s10] sm:$0xff] %vm187_vm0, %v216_v15 }
 0x16a   : > { %405 = shalt.err (!%p402_p10)
}
 0x16b   : > { %s406_s30 = scalar_lea.hbm %s230_s20, 128  ;;  %s410_s9 = scalar_lea.hbm %s633_s3, 256 }
 0x16c   : > { %p407_p2 = scmp.ne.s32.totalorder %s230_s20, %s406_s30  ;;  %p411_p7 = scmp.lt.s32.totalorder %s230_s20, %s633_s3 }
 0x16d   : > { %p412_p0 = scmp.lt.s32.totalorder %s410_s9, %s406_s30 }
 0x16e   : > { %p408_p4 = pnand %p407_p2, %p644_p12 }
 0x16f   : > { %p413_p6 = por %p412_p0, %p411_p7 }
 0x170   : > { %p409_p9 = pneg %p408_p4 }
 0x172   : > { %p414_p11 = pnand %p413_p6, %p409_p9 }
 0x174   : > { %417 = shalt.err (!%p414_p11)
}
 0x175   : > { %318 = dma.vmem_to_hbm [thread:$0]  (%p644_p12), %s233_s11, 128, %s230_s20, %s219_s22  }
 0x176 PF: > { %s244_s6 = sand.u32 1, %s444_s12   ;;  %p645_p13 = scmp.ne.s32.totalorder %s639_s25, 0 }
 0x177   : > { %p646_p1 = scmp.ge.s32.totalorder %s456_s15, 2  ;;  %s245_s7 = scalar_lea.sflag [#allocation4], %s244_s6 }
 0x179   : > { %p325_p3 = pnand %p646_p1, %p645_p13 }
 0x17b   : > { %p326_p5 = pneg %p325_p3 }
 0x17d   : > { %439 = dma.done.wait (%p326_p5), %s245_s7, 128  }
 0x17e   : > { %441 = vsyncadd (%p326_p5), %s245_s7, 4294967168  ;;  %p16_p8 = scmp.ge.s32.totalorder %s505_s18, 4   ;;  %s647_s12 = smov %s448_s13 }
 0x17f   : > { %s648_s13 = smov %s452_s14  ;;  %s649_s14 = smov %s517_s21 }
 0x180   : > { %s650_s15 = smov %s505_s18  ;;  %18 = sbr.rel (!%p16_p8) target bundleno = 5 (0x5), region = 77 }
 0x185   :  { %250 = vsyncpa [#allocation3], 1 }
 0x186   :  { %252 = vsyncpa [#allocation3 + $0x1], 1 }
 0x187   :  { %253 = vsyncpa [#allocation4], 1 }
 0x188   :  { %255 = vsyncpa [#allocation4 + $0x1], 1 }

</bundles_post_ra>
